<compile_context>
chip_gen: v5e
topology: v5e:2x2
jax: 0.10.0
libtpu: 0.0.40
codegen_flags: <defaults>
</compile_context>

<pallas_src>
import math
import numpy as np

import jax
import jax.numpy as jnp
from jax.experimental import pallas as pl
from jax.experimental.pallas import tpu as pltpu


def _sin_pos_emb3d_kernel(pts_ref, w_ref, out_ref):
    # pts_ref: (tile_m, K)      G folded points per row + trailing ones column
    # w_ref:   (K, W_out)       freq-scaled selection + pi/2 phase row
    # out_ref: (tile_m, W_out)  lane-dense output block
    arg = jnp.dot(
        pts_ref[...],
        w_ref[...],
        preferred_element_type=jnp.float32,
        precision=jax.lax.Precision.HIGHEST,  # keep f32 coord*freq accuracy on MXU
    )
    out_ref[...] = jnp.sin(arg).astype(out_ref.dtype)


def _round_up(x, m):
    return ((x + m - 1) // m) * m


def _vmem_capacity_bytes():
    try:
        return int(pltpu.get_tpu_info().vmem_capacity_bytes)
    except Exception:
        return 64 << 20  # conservative default: v7x per-TensorCore VMEM


def sinusoidal_pos_emb_3d(pts, dim, theta=10000, out_block_bytes=None,
                          out_dtype=jnp.float32):
    """Pallas implementation of SinusoidalPosEmb3D.forward.

    pts: (N, 3) float32 (any N; padded internally when needed).
    Returns: (N, 6 * (dim // 6)) `out_dtype`.  Like the PyTorch module, any
    remainder of `dim` not divisible by 6 is dropped.
    """
    assert dim >= 12, "dim must be >= 12 so that div_dim = dim // 6 >= 2"
    N, C = pts.shape
    assert C == 3, "pts last dim must be 3 (x, y, z)"

    div_dim = dim // 6
    out_dim = 6 * div_dim

    # ---- per-generation tuning ----
    vmem_cap = _vmem_capacity_bytes()
    big_vmem = vmem_cap >= (100 << 20)           # v5e / v6e: 128 MiB VMEM
    if out_block_bytes is None:
        out_block_bytes = (8 << 20) if big_vmem else (4 << 20)
    vmem_limit = (64 << 20) if big_vmem else (40 << 20)
    prefer_even_grid = not big_vmem              # v7x: 2 TensorCores per chip

    # ---- fold factor: G consecutive points per output row ----
    # Lane-dense (unmasked) stores need the output last dim to be a multiple
    # of 128.  Cap G so the weight matrix / MXU contraction stays tiny; for
    # out_dim with a small power-of-two factor fall back to G=1 rather than
    # build a tens-of-MB mostly-zero weight matrix.
    if out_dim % 128 == 0:
        G = 1
    else:
        G = math.lcm(out_dim, 128) // out_dim
        if G > 16:
            G = 1
    W_out = G * out_dim
    K = 3 * G + 1                                # +1 ones column carrying phase

    # ---- host-side constants: freq + phase folded into the matmul ----
    emb_scale = math.log(theta) / (div_dim - 1)
    freqs = np.exp(
        np.arange(div_dim, dtype=np.float32) * np.float32(-emb_scale)
    ).astype(np.float32)

    w = np.zeros((K, W_out), np.float32)
    for g in range(G):
        base = g * out_dim
        for c in range(3):                        # c = 0:x, 1:y, 2:z
            s = base + c * 2 * div_dim
            w[3 * g + c, s:s + div_dim] = freqs                   # sin block
            w[3 * g + c, s + div_dim:s + 2 * div_dim] = freqs     # cos block
            w[K - 1, s + div_dim:s + 2 * div_dim] = np.float32(np.pi / 2.0)

    # ---- tile sizing ----
    bytes_per_row = W_out * 4
    M_needed = -(-N // G)                         # ceil(N / G)
    tile_m = max(8, (out_block_bytes // bytes_per_row) // 8 * 8)
    tile_m = min(tile_m, _round_up(M_needed, 8))
    num_steps = -(-M_needed // tile_m)
    if prefer_even_grid and num_steps == 1 and M_needed > 8:
        # v7x: split a single-step grid so both TensorCores get work under
        # dimension_semantics=("parallel",).
        tile_m = max(8, _round_up(-(-M_needed // 2), 8))
    M = _round_up(M_needed, tile_m)
    N_pad = M * G

    pts_f = jnp.asarray(pts, jnp.float32)
    if N_pad != N:
        pts_f = jnp.pad(pts_f, ((0, N_pad - N), (0, 0)))
    pts_fold = pts_f.reshape(M, 3 * G)            # row-major fold: free reshape
    pts_aug = jnp.pad(pts_fold, ((0, 0), (0, 1)), constant_values=1.0)

    out_fold = pl.pallas_call(
        _sin_pos_emb3d_kernel,
        out_shape=jax.ShapeDtypeStruct((M, W_out), out_dtype),
        grid_spec=pltpu.PrefetchScalarGridSpec(
            num_scalar_prefetch=0,
            grid=(M // tile_m,),
            in_specs=[
                pl.BlockSpec((tile_m, K), lambda i: (i, 0)),
                pl.BlockSpec((K, W_out), lambda i: (0, 0)),
            ],
            out_specs=pl.BlockSpec((tile_m, W_out), lambda i: (i, 0)),
        ),
        compiler_params=pltpu.CompilerParams(
            dimension_semantics=("parallel",),
            vmem_limit_bytes=vmem_limit,
        ),
    )(pts_aug, jnp.asarray(w))

    out = out_fold.reshape(N_pad, out_dim)        # free row-major unfold
    if N_pad != N:
        # TODO(synk): when padding was required this slice is a full HBM
        # copy; consumers that can handle the padded buffer should slice at
        # the use site so XLA fuses it away.
        out = out[:N]
    return out


def _reference(pts, dim, theta=10000):
    # Pure-JAX reference mirroring the PyTorch forward exactly.
    div_dim = dim // 6
    emb = math.log(theta) / (div_dim - 1)
    freqs = jnp.exp(jnp.arange(div_dim, dtype=jnp.float32) * -emb)

    def one(coord):
        arg = coord[:, None] * freqs[None, :]
        return jnp.concatenate([jnp.sin(arg), jnp.cos(arg)], axis=-1)

    return jnp.concatenate(
        [one(pts[..., 0]), one(pts[..., 1]), one(pts[..., 2])], axis=-1
    )


if __name__ == "__main__":
    theta = 10000

    # 1) Small case: 16 points, dim=48 -> out_dim=48, folded G=8 -> 384 lanes.
    pts_small = jax.random.normal(jax.random.PRNGKey(0), (16, 3), jnp.float32) * 5.0
    out_small = jax.block_until_ready(sinusoidal_pos_emb_3d(pts_small, 48, theta))
    ref_small = _reference(pts_small, 48, theta)
    assert out_small.shape == ref_small.shape, (out_small.shape, ref_small.shape)
    assert jnp.allclose(out_small, ref_small, atol=5e-5, rtol=1e-4), \
        "small case mismatch vs reference"

    # 2) Larger case: 4096 points, dim=192 -> out_dim=192, G=2 -> 384 lanes.
    pts_big = jax.random.normal(jax.random.PRNGKey(0), (4096, 3), jnp.float32) * 5.0
    out_big = jax.block_until_ready(sinusoidal_pos_emb_3d(pts_big, 192, theta))
    ref_big = _reference(pts_big, 192, theta)
    assert out_big.shape == ref_big.shape, (out_big.shape, ref_big.shape)
    assert jnp.allclose(out_big, ref_big, atol=5e-5, rtol=1e-4), \
        "large case mismatch vs reference"

    # 3) Same data with a forced small block -> multi-step grid + padding path.
    out_tiled = jax.block_until_ready(
        sinusoidal_pos_emb_3d(pts_big, 192, theta, out_block_bytes=256 << 10))
    assert jnp.allclose(out_tiled, ref_big, atol=5e-5, rtol=1e-4), \
        "tiled case mismatch vs reference"

    # 4) Odd div_dim (dim=42 -> out_dim=42): exercises the G=1 fallback
    #    (output width not a multiple of 128, full-extent output block).
    pts_odd = jax.random.normal(jax.random.PRNGKey(0), (16, 3), jnp.float32) * 5.0
    out_odd = jax.block_until_ready(sinusoidal_pos_emb_3d(pts_odd, 42, theta))
    ref_odd = _reference(pts_odd, 42, theta)
    assert out_odd.shape == ref_odd.shape, (out_odd.shape, ref_odd.shape)
    assert jnp.allclose(out_odd, ref_odd, atol=5e-5, rtol=1e-4), \
        "odd-dim fallback mismatch vs reference"

    print("KERNEL_OK")
</pallas_src>

<mosaic_0001>
module attributes {stable_mosaic.version = 11 : i64} {
  func.func @_sin_pos_emb3d_kernel(%arg0: i32, %arg1: memref<8x25xf32, #tpu.memory_space<vmem>>, %arg2: memref<25x384xf32, #tpu.memory_space<vmem>>, %arg3: memref<8x384xf32, #tpu.memory_space<vmem>>) attributes {dimension_semantics = [#tpu.dimension_semantics<parallel>], iteration_bounds = array<i64: 1>, scalar_prefetch = 0 : i64, scratch_operands = 0 : i64, tpu.core_type = #tpu.core_type<tc>, window_params = [{transform_indices = @transform_0, window_bounds = array<i64: 8, 25>}, {pipeline_mode = #tpu.pipeline_mode<synchronous>, transform_indices = @transform_1, window_bounds = array<i64: 25, 384>}, {transform_indices = @transform_2, window_bounds = array<i64: 8, 384>}]} {
    %c0 = arith.constant 0 : index
    %c0_0 = arith.constant 0 : index
    %0 = vector.load %arg1[%c0, %c0_0] : memref<8x25xf32, #tpu.memory_space<vmem>>, vector<8x25xf32>
    %c0_1 = arith.constant 0 : index
    %c0_2 = arith.constant 0 : index
    %1 = vector.load %arg2[%c0_1, %c0_2] : memref<25x384xf32, #tpu.memory_space<vmem>>, vector<25x384xf32>
    %cst = arith.constant dense<0.000000e+00> : vector<8x384xf32>
    %2 = tpu.matmul %0, %1, %cst {dimension_numbers = #tpu.dot_dimension_numbers<[1], [0], [0], [1], [0, 0, 1, 1], [], []>, precision = #tpu.contract_precision<fp32>} : vector<8x25xf32>, vector<25x384xf32>, vector<8x384xf32> -> vector<8x384xf32>
    %3 = math.sin %2 : vector<8x384xf32>
    %c0_3 = arith.constant 0 : index
    %c0_4 = arith.constant 0 : index
    %4 = vector.load %arg3[%c0_3, %c0_4] : memref<8x384xf32, #tpu.memory_space<vmem>>, vector<8x384xf32>
    tpu.vector_store %arg3[%c0_3, %c0_4], %3 {strides = array<i32>} : memref<8x384xf32, #tpu.memory_space<vmem>>, vector<8x384xf32>,
    return
  }
  func.func @transform_0(%arg0: i32) -> (i32, i32) {
    %c0_i32 = arith.constant 0 : i32
    %c0_i32_0 = arith.constant 0 : i32
    return %arg0, %c0_i32 : i32, i32
  }
  func.func @transform_1(%arg0: i32) -> (i32, i32) {
    %c0_i32 = arith.constant 0 : i32
    %c0_i32_0 = arith.constant 0 : i32
    %c0_i32_1 = arith.constant 0 : i32
    return %c0_i32, %c0_i32_0 : i32, i32
  }
  func.func @transform_2(%arg0: i32) -> (i32, i32) {
    %c0_i32 = arith.constant 0 : i32
    %c0_i32_0 = arith.constant 0 : i32
    return %arg0, %c0_i32 : i32, i32
  }
}

</mosaic_0001>

<bundles_post_ra>
// kernel: tpu_custom_call.1
= control target key start
LH: loop header
LB: loop body
LE: loop exit
PB: predicated region body
PF: predicated region fallthrough
CT: control target
= control target key end

     0   :  { %7 = vsyncpa [#allocation3], 0  ;;  %s1682_s0 = inlined_call_operand.hbm [shape: f32[8,25], index: 0, kind: input, shape index: {}]   ;;  %s1683_s1 = inlined_call_operand.hbm [shape: f32[25,384], index: 1, kind: input, shape index: {}]   ;;  %s1684_s2 = inlined_call_operand.hbm [shape: f32[8,384], index: 2, kind: output, shape index: {}]  }
   0x1   :  { %8 = vsyncpa [#allocation6], 0 }
   0x2   :  { %9 = vsyncpa [#allocation4], 0  ;;  %s15_s11 = sshll.u32 %s1682_s0, 4  ;;  %s1209_s12 = smov [#allocation2]   ;;  %s16_s11 = int_to_ptr.hbm [resolvable:$true] %s15_s11 }
   0x3   :  { %s17_s13 = sshll.u32 %s1209_s12, 4  ;;  %s25_s16 = sshll.u32 %s1683_s1, 4  ;;  %s18_s13 = int_to_ptr.vmem [resolvable:$true] %s17_s13  ;;  %s26_s16 = int_to_ptr.hbm [resolvable:$true] %s25_s16 }
   0x4   :  { %20 = dma.hbm_to_vmem [thread:$0]  %s16_s11, 128, %s18_s13, [#allocation3]  }
   0x5   :  { %s1210_s17 = smov [#allocation5]   ;;  %s1211_s19 = smov 384  }
   0x6   :  { %s27_s18 = sshll.u32 %s1210_s17, 4  ;;  %s1212_s20 = smov 24   ;;  %s28_s18 = int_to_ptr.vmem [resolvable:$true] %s27_s18 }
   0x7   :  { %33 = dma.hbm_to_vmem [thread:$0]  %s26_s16, 1536, %s28_s18, [#allocation6], %s1211_s19, %s1211_s19, %s1212_s20  }
   0x8   :  { %1203 = dma.done.wait [#allocation3], 128  }
   0x9   :  { %1204 = vsyncadd [#allocation3], 4294967168 }
   0xa   :  { %1205 = dma.done.wait [#allocation6], 1536  }
   0xb   :  { %1206 = vsyncadd [#allocation6], 4294965760  ;;  %vm59_vm0 = vcmask 1040384   ;;  %vm55_vm1 = vcmask 203776   ;;  %v52_v0 = vld [vmem:[#allocation5 + $0x48] sm:$0x1] }
   0xc   :  { %v49_v1 = vld [vmem:[#allocation5 + $0x30] sm:$0xff]  ;;  %v46_v2 = vld [vmem:[#allocation5 + $0x18] sm:$0xff]  ;;  %v61_v3 = vsel %vm59_vm0, %v52_v0, 0  ;;  %v43_v6 = vld [vmem:[#allocation5] sm:$0xff]  ;;  %s1220_s0 = smov [#allocation7]   ;;  %s1099_s23 = sshll.u32 %s1684_s2, 4  ;;  %s1100_s23 = int_to_ptr.hbm [resolvable:$true] %s1099_s23 }
   0xd   :  { %v1243_v4 = vand.u32 4294901760, %v49_v1  ;;  %v1245_v5 = vand.u32 4294901760, %v46_v2  ;;  %v42_v7 = vld [vmem:[#allocation2] sm:$0xff]  ;;  %v1247_v9 = vand.u32 4294901760, %v61_v3  ;;  %v1249_v10 = vand.u32 4294901760, %v43_v6  ;;  %v47_v18 = vld [vmem:[#allocation5 + $0x20] sm:$0xff] }
   0xe   :  { %v50_v8 = vld [vmem:[#allocation5 + $0x38] sm:$0xff]  ;;  %v57_v11 = vsel %vm55_vm1, %v42_v7, 0  ;;  %v53_v12 = vld [vmem:[#allocation5 + $0x50] sm:$0x1]  ;;  %v1278_v26 = vand.u32 4294901760, %v47_v18  ;;  %v44_v37 = vld [vmem:[#allocation5 + $0x8] sm:$0xff] }
   0xf   :  { %v1251_v13 = vand.u32 4294901760, %v50_v8  ;;  %v1254_v14 = vsub.f32 %v49_v1, %v1243_v4  ;;  %v1257_v15 = vsub.f32 %v46_v2, %v1245_v5  ;;  %v1259_v16 = vand.u32 4294901760, %v57_v11  ;;  %82 = vmatpush.msra.mxu0 %v1247_v9  ;;  %182 = vmatpush.msra.mxu3 %v1247_v9  ;;  %v54_v50 = vld [vmem:[#allocation5 + $0x58] sm:$0x1]  ;;  %v51_v58 = vld [vmem:[#allocation5 + $0x40] sm:$0xff]  ;;  %v48_v61 = vld [vmem:[#allocation5 + $0x28] sm:$0xff] }
  0x10   :  { %v64_v17 = vsel %vm59_vm0, %v53_v12, 0  ;;  %v111_v19 = vsub.f32 %v61_v3, %v1247_v9  ;;  %v1266_v20 = vsub.f32 %v43_v6, %v1249_v10  ;;  %v1292_v33 = vsub.f32 %v47_v18, %v1278_v26  ;;  %v45_v63 = vld [vmem:[#allocation5 + $0x10] sm:$0xff]  ;;  %s1097_s1 = sshll.u32 %s1220_s0, 4  ;;  %s1098_s1 = int_to_ptr.vmem [resolvable:$true] %s1097_s1 }
  0x11   :  { %v1268_v21 = vand.u32 4294901760, %v64_v17  ;;  %v1271_v22 = vsub.f32 %v50_v8, %v1251_v13  ;;  %v118_v23 = vand.u32 4294901760, %v1254_v14  ;;  %v1275_v24 = vsub.f32 %v57_v11, %v1259_v16  ;;  %84 = vmatpush.msra.mxu0 %v1243_v4  ;;  %184 = vmatpush.msra.mxu3 %v1243_v4 }
  0x12   :  { %v124_v25 = vand.u32 4294901760, %v1257_v15  ;;  %153 = vmatpush.msra.mxu2 %v111_v19  ;;  %v112_v27 = vand.u32 4294901760, %v111_v19  ;;  %v130_v29 = vand.u32 4294901760, %v1266_v20  ;;  %v309_v40 = vand.u32 4294901760, %v1292_v33 }
  0x13   :  { %v1282_v28 = vsub.f32 %v64_v17, %v1268_v21  ;;  %v303_v30 = vand.u32 4294901760, %v1271_v22  ;;  %v119_v31 = vsub.f32 %v1254_v14, %v118_v23  ;;  %v1289_v32 = vand.u32 4294901760, %v1275_v24  ;;  %86 = vmatpush.msra.mxu0 %v1245_v5  ;;  %186 = vmatpush.msra.mxu3 %v1245_v5 }
  0x14   :  { %156 = vmatpush.msra.mxu2 %v1254_v14  ;;  %v113_v34 = vsub.f32 %v111_v19, %v112_v27  ;;  %v125_v35 = vsub.f32 %v1257_v15, %v124_v25  ;;  %v131_v44 = vsub.f32 %v1266_v20, %v130_v29  ;;  %v1312_v46 = vand.u32 4294901760, %v44_v37 }
  0x15   :  { %v297_v36 = vand.u32 4294901760, %v1282_v28  ;;  %v92_v38 = vsub.f32 %v1275_v24, %v1289_v32  ;;  %v304_v39 = vsub.f32 %v1271_v22, %v303_v30  ;;  %88 = vmatpush.msra.mxu0 %v1249_v10  ;;  %v120_v42 = vand.u32 4294901760, %v119_v31  ;;  %188 = vmatpush.msra.mxu3 %v1249_v10 }
  0x16   :  { %v114_v41 = vand.u32 4294901760, %v113_v34  ;;  %159 = vmatpush.msra.mxu2 %v1257_v15  ;;  %v126_v47 = vand.u32 4294901760, %v125_v35  ;;  %v310_v49 = vsub.f32 %v1292_v33, %v309_v40  ;;  %v314_v52 = vsub.f32 %v44_v37, %v1312_v46  ;;  %192 = vmatmul.f32.vlgmr.msra.gmra.mxu3 %v1289_v32 }
  0x17   :  { %v298_v43 = vsub.f32 %v1282_v28, %v297_v36  ;;  %v1310_v45 = vand.u32 4294901760, %v92_v38  ;;  %211 = vmatpush.msrb.mxu0 %v112_v27  ;;  %v305_v51 = vand.u32 4294901760, %v304_v39  ;;  %v132_v53 = vand.u32 4294901760, %v131_v44 }
  0x18   :  { %115 = vmatpush.msra.mxu1 %v114_v41  ;;  %162 = vmatpush.msra.mxu2 %v1266_v20  ;;  %v315_v54 = vand.u32 4294901760, %v314_v52  ;;  %v67_v55 = vsel %vm59_vm0, %v54_v50, 0  ;;  %v311_v56 = vand.u32 4294901760, %v310_v49  ;;  %v1330_v62 = vand.u32 4294901760, %v51_v58 }
  0x19   :  { %v299_v48 = vand.u32 4294901760, %v298_v43  ;;  %94 = vmatmul.f32.vlgmr.msra.gmra.mxu0 %v1310_v45  ;;  %165 = vmatmul.f32.vlgmr.msra.gmra.mxu2 %v1275_v24  ;;  %v1325_v59 = vand.u32 4294901760, %v67_v55  ;;  %v1337_v1 = vand.u32 4294901760, %v48_v61  ;;  %v1344_v3 = vand.u32 4294901760, %v45_v63 }
  0x1a   :  { %121 = vmatpush.msra.mxu1 %v120_v42  ;;  %267 = vmatpush.msrb.mxu2 %v1268_v21  ;;  %v316_v57 = vsub.f32 %v314_v52, %v315_v54  ;;  %v487_v2 = vsub.f32 %v51_v58, %v1330_v62 }
  0x1b   :  { %300 = vmatpush.msrb.mxu3 %v299_v48  ;;  %215 = vmatpush.msrb.mxu0 %v118_v23  ;;  %v1335_v0 = vsub.f32 %v67_v55, %v1325_v59  ;;  %v493_v6 = vsub.f32 %v48_v61, %v1337_v1  ;;  %v499_v7 = vsub.f32 %v45_v63, %v1344_v3  ;;  %v1217_v63 = vmov 920167782  }
  0x1c   :  { %127 = vmatpush.msra.mxu1 %v126_v47  ;;  %269 = vmatpush.msrb.mxu2 %v1251_v13  ;;  %v317_v60 = vand.u32 4294901760, %v316_v57  ;;  %v1215_v57 = vmov 2131351028  }
  0x1d   :  { %306 = vmatpush.msrb.mxu3 %v305_v51  ;;  %219 = vmatpush.msrb.mxu0 %v124_v25  ;;  %v500_v11 = vand.u32 4294901760, %v499_v7  ;;  %v1213_v51 = vmov 683565275  }
  0x1e   :  { %133 = vmatpush.msra.mxu1 %v132_v53  ;;  %271 = vmatpush.msrb.mxu2 %v1278_v26  ;;  %v1214_v53 = vmov 2475754826  }
  0x1f   :  { %135 = vmatmul.f32.vlgmr.msra.gmra.mxu1 %v1259_v16  ;;  %312 = vmatpush.msrb.mxu3 %v311_v56  ;;  %v501_v15 = vsub.f32 %v499_v7, %v500_v11 }
  0x20   :  { %242 = vmatpush.msrb.mxu1 %v1247_v9  ;;  %273 = vmatpush.msrb.mxu2 %v1312_v46  ;;  %v494_v9 = vand.u32 4294901760, %v493_v6 }
  0x21   :  { %223 = vmatpush.msrb.mxu0 %v130_v29  ;;  %318 = vmatpush.msrb.mxu3 %v317_v60  ;;  %v502_v18 = vand.u32 4294901760, %v501_v15  ;;  %v1216_v60 = vmov 2102212464  }
  0x22   :  { %244 = vmatpush.msrb.mxu1 %v1243_v4  ;;  %225 = vmatmul.f32.vlgmr.msrb.gmra.mxu0 %v1259_v16  ;;  %v482_v4 = vand.u32 4294901760, %v1335_v0  ;;  %v495_v14 = vsub.f32 %v493_v6, %v494_v9 }
  0x23   :  { %279 = vmatmul.f32.vlgmr.msrb.gmra.mxu2 %v1310_v45  ;;  %320 = vmatmul.f32.vlgmr.msrb.gmra.mxu3 %v1259_v16 }
  0x24   :  { %246 = vmatpush.msrb.mxu1 %v1245_v5  ;;  %396 = vmatpush.msra.mxu2 %v297_v36  ;;  %v488_v5 = vand.u32 4294901760, %v487_v2  ;;  %v483_v8 = vsub.f32 %v1335_v0, %v482_v4  ;;  %v496_v17 = vand.u32 4294901760, %v495_v14 }
  0x25   :  { %338 = vmatpush.msra.mxu0 %v1282_v28  ;;  %427 = vmatpush.msra.mxu3 %v1268_v21 }
  0x26   :  { %248 = vmatpush.msrb.mxu1 %v1249_v10  ;;  %400 = vmatpush.msra.mxu2 %v303_v30  ;;  %v489_v10 = vsub.f32 %v487_v2, %v488_v5  ;;  %v484_v12 = vand.u32 4294901760, %v483_v8 }
  0x27   :  { %341 = vmatpush.msra.mxu0 %v1271_v22  ;;  %250 = vmatmul.f32.vlgmr.msrb.gmra.mxu1 %v1259_v16 }
  0x28   :  { %429 = vmatpush.msra.mxu3 %v1251_v13  ;;  %367 = vmatpush.msra.mxu1 %v1268_v21 }
  0x29   :  { %404 = vmatpush.msra.mxu2 %v309_v40  ;;  %344 = vmatpush.msra.mxu0 %v1292_v33 }
  0x2a   :  { %431 = vmatpush.msra.mxu3 %v1278_v26  ;;  %369 = vmatpush.msra.mxu1 %v1251_v13  ;;  %v490_v13 = vand.u32 4294901760, %v489_v10 }
  0x2b   :  { %408 = vmatpush.msra.mxu2 %v315_v54  ;;  %347 = vmatpush.msra.mxu0 %v314_v52 }
  0x2c   :  { %410 = vmatmul.f32.vlgmr.msra.gmra.mxu2 %v1259_v16  ;;  %350 = vmatmul.f32.vlgmr.msra.gmra.mxu0 %v1275_v24 }
  0x2d   :  { %371 = vmatpush.msra.mxu1 %v1278_v26  ;;  %433 = vmatpush.msra.mxu3 %v1312_v46 }
  0x2e   :  { %523 = vmatpush.msrb.mxu2 %v1335_v0  ;;  %435 = vmatmul.f32.vlgmr.msra.gmra.mxu3 %v1259_v16 }
  0x2f   :  { %373 = vmatpush.msra.mxu1 %v1312_v46  ;;  %452 = vmatpush.msrb.mxu0 %v1325_v59 }
  0x30   :  { %526 = vmatpush.msrb.mxu2 %v487_v2  ;;  %552 = vmatpush.msrb.mxu3 %v1325_v59  ;;  %v1218_v2 = vmov 1326507024  }
  0x31   :  { %377 = vmatmul.f32.vlgmr.msra.gmra.mxu1 %v1289_v32  ;;  %454 = vmatpush.msrb.mxu0 %v1330_v62 }
  0x32   :  { %485 = vmatpush.msrb.mxu1 %v484_v12  ;;  %529 = vmatpush.msrb.mxu2 %v493_v6 }
  0x33   :  { %554 = vmatpush.msrb.mxu3 %v1330_v62  ;;  %456 = vmatpush.msrb.mxu0 %v1337_v1 }
  0x34   :  { %491 = vmatpush.msrb.mxu1 %v490_v13  ;;  %532 = vmatpush.msrb.mxu2 %v499_v7 }
  0x35   :  { %556 = vmatpush.msrb.mxu3 %v1337_v1  ;;  %458 = vmatpush.msrb.mxu0 %v1344_v3 }
  0x36   :  { %497 = vmatpush.msrb.mxu1 %v496_v17  ;;  %535 = vmatmul.f32.vlgmr.msrb.gmra.mxu2 %v1275_v24 }
  0x37   :  { %558 = vmatpush.msrb.mxu3 %v1344_v3  ;;  %464 = vmatmul.f32.vlgmr.msrb.gmra.mxu0 %v1310_v45 }
  0x38   :  { %503 = vmatpush.msrb.mxu1 %v502_v18  ;;  %562 = vmatmul.f32.vlgmr.msrb.gmra.mxu3 %v1289_v32 }
  0x39   :  { %581 = vmatpush.msra.mxu0 %v482_v4  ;;  %505 = vmatmul.f32.vlgmr.msrb.gmra.mxu1 %v1259_v16 }
  0x3a   :  { %612 = vmatpush.msra.mxu1 %v1325_v59 }
  0x3b   :  { %585 = vmatpush.msra.mxu0 %v488_v5 }
  0x3c   :  { %614 = vmatpush.msra.mxu1 %v1330_v62 }
  0x3d   :  { %589 = vmatpush.msra.mxu0 %v494_v9 }
  0x3e   :  { %616 = vmatpush.msra.mxu1 %v1337_v1 }
  0x3f   :  { %593 = vmatpush.msra.mxu0 %v500_v11 }
  0x40   :  { %595 = vmatmul.f32.vlgmr.msra.gmra.mxu0 %v1259_v16  ;;  %618 = vmatpush.msra.mxu1 %v1344_v3 }
  0x41   :  { %620 = vmatmul.f32.vlgmr.msra.gmra.mxu1 %v1259_v16 }
  0x96   :  { %v95_v19 = vpop.f32.mrf.mxu0 }
  0x99   :  { %v193_v23 = vpop.f32.mrf.mxu3 }
  0x9c   :  { %v136_v20 = vpop.f32.mrf.mxu1  ;;  %v166_v21 = vpop.f32.mrf.mxu2 }
  0x9d   :  { %v137_v22 = vadd.f32 %v136_v20, %v95_v19 }
  0x9f   :  { %v167_v24 = vadd.f32 %v166_v21, %v137_v22  ;;  %v226_v25 = vpop.f32.mrf.mxu0 }
  0xa1   :  { %v194_v26 = vadd.f32 %v193_v23, %v167_v24 }
  0xa3   :  { %v227_v27 = vadd.f32 %v226_v25, %v194_v26 }
  0xa4   :  { %v251_v28 = vpop.f32.mrf.mxu1 }
  0xa5   :  { %v1390_v29 = vadd.f32 %v251_v28, %v227_v27 }
  0xa6   :  { %v280_v30 = vpop.f32.mrf.mxu2  ;;  %v321_v31 = vpop.f32.mrf.mxu3 }
  0xa7   :  { %v624_v32 = vand.u32 2147483647, %v1390_v29  ;;  %v627_v33 = vand.u32 2139095040, %v1390_v29  ;;  %v322_v34 = vadd.f32 %v321_v31, %v280_v30 }
  0xa9   :  { %v628_v16 = vshrl.u32 %v627_v33, 23  ;;  %v351_v35 = vpop.f32.mrf.mxu0  ;;  %v631_v37 = vand.u32 8388607, %v624_v32 }
  0xaa   :  { %v352_v38 = vadd.f32 %v351_v35, %v322_v34 }
  0xab   :  { %v1110_v36 = vadd.s32 4294967169, %v628_v16  ;;  %v632_v43 = vor.u32 8388608, %v631_v37 }
  0xad   :  { %v634_v39 = vadd.s32 1, %v1110_v36  ;;  %v1396_v49 = vshll.u32 %v632_v43, 8 }
  0xae   :  { %v378_v40 = vpop.f32.mrf.mxu1 }
  0xaf   :  { %v379_v41 = vadd.f32 %v378_v40, %v352_v38  ;;  %v411_v42 = vpop.f32.mrf.mxu2  ;;  %vm635_vm2 = vcmp.gt.s32.totalorder %v634_v39, 0  ;;  %v673_v13 = vand.u32 65535, %v1396_v49  ;;  %v674_v21 = vshrl.u32 %v1396_v49, 16 }
  0xb0   :  { %v636_v44 = vsel %vm635_vm2, %v634_v39, 0 }
  0xb1   :  { %v412_v45 = vadd.f32 %v411_v42, %v379_v41  ;;  %v638_v46 = vand.u32 31, %v636_v44  ;;  %v436_v47 = vpop.f32.mrf.mxu3  ;;  %v1398_v50 = vshrl.u32 %v636_v44, 5 }
  0xb3   :  { %v639_v48 = vsub.s32 32, %v638_v46  ;;  %v641_v52 = vshll.u32 %v1213_v51, %v638_v46  ;;  %v644_v54 = vshll.u32 %v1214_v53, %v638_v46  ;;  %v1402_v55 = vadd.f32 %v436_v47, %v412_v45 }
  0xb4   :  { %v647_v59 = vshll.u32 %v1215_v57, %v638_v46  ;;  %v650_v62 = vshll.u32 %v1216_v60, %v638_v46  ;;  %v653_v1 = vshll.u32 %v1217_v63, %v638_v46  ;;  %vm656_vm3 = vcmp.lt.s32.totalorder %v1398_v50, 1 }
  0xb5   :  { %v642_v56 = vshrl.u32 %v1214_v53, %v639_v48  ;;  %v645_v58 = vshrl.u32 %v1215_v57, %v639_v48  ;;  %v648_v61 = vshrl.u32 %v1216_v60, %v639_v48  ;;  %v651_v0 = vshrl.u32 %v1217_v63, %v639_v48 }
  0xb6   :  { %v654_v3 = vshrl.u32 %v1218_v2, %v639_v48  ;;  %v782_v9 = vand.u32 2139095040, %v1402_v55  ;;  %vm659_vm4 = vcmp.lt.s32.totalorder %v1398_v50, 4  ;;  %vm658_vm5 = vcmp.lt.s32.totalorder %v1398_v50, 3 }
  0xb7   :  { %v643_v4 = vor.u32 %v642_v56, %v641_v52  ;;  %v646_v6 = vor.u32 %v645_v58, %v644_v54  ;;  %v649_v5 = vor.u32 %v648_v61, %v647_v59  ;;  %v652_v7 = vor.u32 %v651_v0, %v650_v62  ;;  %v506_v0 = vpop.f32.mrf.mxu1 }
  0xb8   :  { %v655_v8 = vor.u32 %v654_v3, %v653_v1  ;;  %vm657_vm6 = vcmp.lt.s32.totalorder %v1398_v50, 2  ;;  %v783_v18 = vshrl.u32 %v782_v9, 23  ;;  %v779_v22 = vand.u32 2147483647, %v1402_v55 }
  0xb9   :  { %v664_v10 = vsel %vm656_vm3, %v643_v4, %v646_v6  ;;  %v668_v11 = vsel %vm656_vm3, %v646_v6, %v649_v5  ;;  %v665_v12 = vsel %vm659_vm4, %v652_v7, 920167782  ;;  %v640_v27 = vshrl.u32 %v1213_v51, %v639_v48 }
  0xba   :  { %v669_v14 = vsel %vm659_vm4, %v655_v8, 1326507024  ;;  %v666_v15 = vsel %vm658_vm5, %v649_v5, %v665_v12  ;;  %v661_v28 = vsel %vm659_vm4, %v649_v5, 2102212464  ;;  %v1113_v33 = vadd.s32 4294967169, %v783_v18 }
  0xbb   :  { %v670_v17 = vsel %vm658_vm5, %v652_v7, %v669_v14  ;;  %v667_v19 = vsel %vm657_vm6, %v664_v10, %v666_v15  ;;  %v660_v34 = vsel %vm656_vm3, %v640_v27, %v643_v4  ;;  %v662_v36 = vsel %vm658_vm5, %v646_v6, %v661_v28  ;;  %v465_v10 = vpop.f32.mrf.mxu0 }
  0xbc   :  { %v671_v20 = vsel %vm657_vm6, %v668_v11, %v670_v17  ;;  %v697_v25 = vand.u32 65535, %v667_v19  ;;  %v698_v26 = vshrl.u32 %v667_v19, 16  ;;  %v1445_v39 = vand.u32 8388607, %v779_v22 }
  0xbd   :  { %v675_v23 = vand.u32 65535, %v671_v20  ;;  %v676_v24 = vshrl.u32 %v671_v20, 16  ;;  %v789_v46 = vadd.s32 1, %v1113_v33  ;;  %v1219_v47 = vmov 0  }
  0xbe   :  { %v700_v16 = vmul.u32 %v698_v26, %v673_v13  ;;  %v701_v35 = vmul.u32 %v697_v25, %v674_v21  ;;  %v699_v41 = vmul.u32 %v697_v25, %v673_v13  ;;  %v702_v42 = vmul.u32 %v698_v26, %v674_v21 }
  0xbf   :  { %v678_v30 = vmul.u32 %v676_v24, %v673_v13  ;;  %v679_v31 = vmul.u32 %v675_v23, %v674_v21  ;;  %v677_v37 = vmul.u32 %v675_v23, %v673_v13  ;;  %v680_v40 = vmul.u32 %v676_v24, %v674_v21 }
  0xc0   :  { %v703_v43 = vshll.u32 %v700_v16, 16  ;;  %v705_v52 = vshll.u32 %v701_v35, 16  ;;  %vm790_vm10 = vcmp.gt.s32.totalorder %v789_v46, 0  ;;  %v663_v59 = vsel %vm657_vm6, %v660_v34, %v662_v36  ;;  %v536_v36 = vpop.f32.mrf.mxu2 }
  0xc1   :  { %v681_v38 = vshll.u32 %v678_v30, 16  ;;  %v683_v44 = vshll.u32 %v679_v31, 16  ;;  %v682_v1 = vshrl.u32 %v678_v30, 16  ;;  %v791_v6 = vsel %vm790_vm10, %v789_v46, 0 }
  0xc2   :  { %vm707_vm8 = vc.u32 %v699_v41, %v703_v43  ;;  %v709_v54 = vadd.s32 %v703_v43, %v699_v41  ;;  %v704_v5 = vshrl.u32 %v700_v16, 16  ;;  %v787_v8 = vor.u32 8388608, %v1445_v39 }
  0xc3   :  { %vm685_vm7 = vc.u32 %v677_v37, %v681_v38  ;;  %v687_v45 = vadd.s32 %v681_v38, %v677_v37  ;;  %v708_v58 = vsel %vm707_vm8, 1, %v1219_v47  ;;  %v793_v9 = vand.u32 31, %v791_v6 }
  0xc4   :  { %v686_v48 = vsel %vm685_vm7, 1, %v1219_v47  ;;  %v710_v62 = vadd.s32 %v708_v58, %v702_v42  ;;  %vm711_vm11 = vc.u32 %v709_v54, %v705_v52  ;;  %v684_v11 = vshrl.u32 %v679_v31, 16  ;;  %v563_v58 = vpop.f32.mrf.mxu3 }
  0xc5   :  { %v688_v56 = vadd.s32 %v686_v48, %v680_v40  ;;  %vm689_vm9 = vc.u32 %v687_v45, %v683_v44  ;;  %v712_v4 = vsel %vm711_vm11, 1, %v1219_v47  ;;  %v706_v50 = vshrl.u32 %v701_v35, 16 }
  0xc6   :  { %v690_v61 = vsel %vm689_vm9, 1, %v1219_v47  ;;  %v714_v7 = vadd.s32 %v712_v4, %v710_v62  ;;  %v507_v14 = vadd.f32 %v506_v0, %v465_v10  ;;  %v1454_v13 = vadd.s32 %v709_v54, %v705_v52  ;;  %v596_v10 = vpop.f32.mrf.mxu0 }
  0xc7   :  { %v692_v3 = vadd.s32 %v690_v61, %v688_v56  ;;  %v1456_v17 = vshrl.u32 %v791_v6, 5  ;;  %v794_v18 = vsub.s32 32, %v793_v9  ;;  %v796_v20 = vshll.u32 %v1213_v51, %v793_v9 }
  0xc8   :  { %v715_v15 = vadd.s32 %v714_v7, %v704_v5  ;;  %v799_v21 = vshll.u32 %v1214_v53, %v793_v9  ;;  %v802_v23 = vshll.u32 %v1215_v57, %v793_v9  ;;  %v805_v27 = vshll.u32 %v1216_v60, %v793_v9 }
  0xc9   :  { %v693_v12 = vadd.s32 %v692_v3, %v682_v1  ;;  %v797_v25 = vshrl.u32 %v1214_v53, %v794_v18  ;;  %v800_v26 = vshrl.u32 %v1215_v57, %v794_v18  ;;  %v803_v28 = vshrl.u32 %v1216_v60, %v794_v18 }
  0xca   :  { %v716_v24 = vadd.s32 %v715_v15, %v706_v50  ;;  %v806_v30 = vshrl.u32 %v1217_v63, %v794_v18  ;;  %v808_v31 = vshll.u32 %v1217_v63, %v793_v9  ;;  %v809_v35 = vshrl.u32 %v1218_v2, %v794_v18 }
  0xcb   :  { %v1458_v19 = vadd.s32 %v693_v12, %v684_v11  ;;  %v1471_v34 = vor.u32 %v797_v25, %v796_v20  ;;  %v1473_v16 = vor.u32 %v800_v26, %v799_v21  ;;  %v717_v37 = vmul.u32 %v1396_v49, %v663_v59  ;;  %v621_v26 = vpop.f32.mrf.mxu1 }
  0xcc   :  { %v720_v33 = vadd.s32 1, %v716_v24  ;;  %v1477_v38 = vor.u32 %v803_v28, %v802_v23  ;;  %v807_v39 = vor.u32 %v806_v30, %v805_v27  ;;  %v810_v41 = vor.u32 %v809_v35, %v808_v31 }
  0xcd   :  { %vm719_vm12 = vc.u32 %v1458_v19, %v1454_v13  ;;  %vm811_vm13 = vcmp.lt.s32.totalorder %v1456_v17, 1  ;;  %v1480_v42 = vshll.u32 %v787_v8, 8  ;;  %vm814_vm14 = vcmp.lt.s32.totalorder %v1456_v17, 4 }
  0xce   :  { %v721_v40 = vsel %vm719_vm12, %v720_v33, %v716_v24  ;;  %v819_v44 = vsel %vm811_vm13, %v1471_v34, %v1473_v16  ;;  %v537_v45 = vadd.f32 %v536_v36, %v507_v14  ;;  %vm813_vm15 = vcmp.lt.s32.totalorder %v1456_v17, 3 }
  0xcf   :  { %v722_v43 = vadd.s32 %v721_v40, %v717_v37  ;;  %v820_v49 = vsel %vm814_vm14, %v807_v39, 920167782  ;;  %v823_v46 = vsel %vm811_vm13, %v1473_v16, %v1477_v38  ;;  %v824_v48 = vsel %vm814_vm14, %v810_v41, 1326507024 }
  0xd0   :  { %vm812_vm0 = vcmp.lt.s32.totalorder %v1456_v17, 2  ;;  %v821_v54 = vsel %vm813_vm15, %v1477_v38, %v820_v49  ;;  %v825_v56 = vsel %vm813_vm15, %v807_v39, %v824_v48  ;;  %v828_v0 = vand.u32 65535, %v1480_v42 }
  0xd1   :  { %v723_v52 = vadd.s32 536870912, %v722_v43  ;;  %v822_v59 = vsel %vm812_vm0, %v819_v44, %v821_v54  ;;  %v826_v61 = vsel %vm812_vm0, %v823_v46, %v825_v56  ;;  %v829_v4 = vshrl.u32 %v1480_v42, 16 }
  0xd2   :  { %v830_v1 = vand.u32 65535, %v826_v61  ;;  %v831_v3 = vshrl.u32 %v826_v61, 16  ;;  %v853_v6 = vshrl.u32 %v822_v59, 16  ;;  %v564_v5 = vadd.f32 %v563_v58, %v537_v45 }
  0xd3   :  { %v1506_v62 = vshrl.u32 %v723_v52, 30  ;;  %v852_v9 = vand.u32 65535, %v822_v59  ;;  %v795_v20 = vshrl.u32 %v1213_v51, %v794_v18  ;;  %v718_v33 = vadd.s32 %v1454_v13, %v1458_v19 }
  0xd4   :  { %v833_v8 = vmul.u32 %v831_v3, %v828_v0  ;;  %v834_v11 = vmul.u32 %v830_v1, %v829_v4  ;;  %v855_v12 = vmul.u32 %v853_v6, %v828_v0  ;;  %v832_v14 = vmul.u32 %v830_v1, %v828_v0 }
  0xd5   :  { %v725_v7 = vshll.u32 %v1506_v62, 30  ;;  %v835_v21 = vmul.u32 %v831_v3, %v829_v4  ;;  %v597_v23 = vadd.f32 %v596_v10, %v564_v5  ;;  %v856_v25 = vmul.u32 %v852_v9, %v829_v4 }
  0xd6   :  { %v836_v15 = vshll.u32 %v833_v8, 16  ;;  %v838_v27 = vshll.u32 %v834_v11, 16  ;;  %v858_v31 = vshll.u32 %v855_v12, 16  ;;  %v854_v37 = vmul.u32 %v852_v9, %v828_v0 }
  0xd7   :  { %v726_v50 = vsub.s32 %v722_v43, %v725_v7  ;;  %v857_v18 = vmul.u32 %v853_v6, %v829_v4  ;;  %v1515_v40 = vadd.f32 %v621_v26, %v597_v23  ;;  %v860_v43 = vshll.u32 %v856_v25, 16 }
  0xd8   :  { %vm840_vm2 = vc.u32 %v832_v14, %v836_v15  ;;  %v842_v30 = vadd.s32 %v836_v15, %v832_v14  ;;  %vm862_vm4 = vc.u32 %v854_v37, %v858_v31  ;;  %v864_v44 = vadd.s32 %v858_v31, %v854_v37 }
  0xd9   :  { %vm727_vm1 = vcmp.lt.s32.totalorder %v726_v50, 0  ;;  %v728_v24 = vsub.s32 0, %v726_v50  ;;  %v841_v28 = vsel %vm840_vm2, 1, %v1219_v47  ;;  %v837_v49 = vshrl.u32 %v833_v8, 16 }
  0xda   :  { %v843_v36 = vadd.s32 %v841_v28, %v835_v21  ;;  %vm844_vm3 = vc.u32 %v842_v30, %v838_v27  ;;  %v863_v48 = vsel %vm862_vm4, 1, %v1219_v47  ;;  %v816_v13 = vsel %vm814_vm14, %v1477_v38, 2102212464 }
  0xdb   :  { %v729_v35 = vsel %vm727_vm1, %v728_v24, %v726_v50  ;;  %v845_v41 = vsel %vm844_vm3, 1, %v1219_v47  ;;  %v839_v19 = vshrl.u32 %v834_v11, 16  ;;  %v865_v52 = vadd.s32 %v863_v48, %v857_v18 }
  0xdc   :  { %v730_v39 = vclz %v729_v35  ;;  %v847_v46 = vadd.s32 %v845_v41, %v843_v36  ;;  %vm866_vm5 = vc.u32 %v864_v44, %v860_v43  ;;  %v937_v58 = vand.u32 2139095040, %v1515_v40 }
  0xdd   :  { %v867_v56 = vsel %vm866_vm5, 1, %v1219_v47  ;;  %v815_v61 = vsel %vm811_vm13, %v795_v20, %v1471_v34  ;;  %v859_v0 = vshrl.u32 %v855_v12, 16  ;;  %v817_v38 = vsel %vm813_vm15, %v1473_v16, %v816_v13 }
  0xde   :  { %v1111_v45 = vadd.s32 4294967294, %v730_v39  ;;  %v848_v54 = vadd.s32 %v847_v46, %v837_v49  ;;  %v869_v1 = vadd.s32 %v867_v56, %v865_v52  ;;  %v861_v5 = vshrl.u32 %v856_v25, 16 }
  0xdf   :  { %v938_v8 = vshrl.u32 %v937_v58, 23  ;;  %v1532_v14 = vadd.s32 %v864_v44, %v860_v43  ;;  %v818_v34 = vsel %vm812_vm0, %v815_v61, %v817_v38  ;;  %v934_v23 = vand.u32 2147483647, %v1515_v40 }
  0xe0   :  { %vm1112_vm6 = vcmp.lt.s32.totalorder %v1111_v45, 0  ;;  %v1530_v6 = vadd.s32 %v848_v54, %v839_v19  ;;  %v870_v7 = vadd.s32 %v869_v1, %v859_v0  ;;  %vm1546_vm9 = vcmp.le.f32.partialorder %v624_v32, 0.7853982 }
  0xe1   :  { %v733_v59 = vsel %vm1112_vm6, 0, %v1111_v45  ;;  %v1116_v15 = vadd.s32 4294967169, %v938_v8  ;;  %v941_v31 = vand.u32 8388607, %v934_v23  ;;  %vm626_vm10 = vcmp.lt.s32.totalorder %v1390_v29, 0 }
  0xe2   :  { %v734_v3 = vsub.s32 32, %v733_v59  ;;  %v738_v4 = vsub.s32 4294967266, %v733_v59  ;;  %v735_v9 = vshll.u32 %v726_v50, %v733_v59  ;;  %v871_v12 = vadd.s32 %v870_v7, %v861_v5 }
  0xe3   :  { %vm874_vm7 = vc.u32 %v1530_v6, %v1532_v14  ;;  %v944_v24 = vadd.s32 1, %v1116_v15  ;;  %v872_v50 = vmul.u32 %v1480_v42, %v818_v34  ;;  %v942_v41 = vor.u32 8388608, %v941_v31 }
  0xe4   :  { %v736_v10 = vshrl.u32 %v718_v33, %v734_v3  ;;  %v739_v11 = vadd.s32 127, %v738_v4  ;;  %v875_v16 = vadd.s32 1, %v871_v12  ;;  %v748_v5 = vsub.s32 4, %v1506_v62 }
  0xe5   :  { %vm945_vm8 = vcmp.gt.s32.totalorder %v944_v24, 0  ;;  %vm781_vm1 = vcmp.lt.s32.totalorder %v1402_v55, 0  ;;  %vm1631_vm3 = vcmp.le.f32.partialorder %v779_v22, 0.7853982 }
  0xe6   :  { %v737_v20 = vor.u32 %v736_v10, %v735_v9  ;;  %v740_v21 = vshll.u32 %v739_v11, 23  ;;  %v876_v26 = vsel %vm874_vm7, %v875_v16, %v871_v12  ;;  %v946_v30 = vsel %vm945_vm8, %v944_v24, 0 }
  0xe7   :  { %v877_v17 = vadd.s32 %v876_v26, %v872_v50  ;;  %v948_v33 = vand.u32 31, %v946_v30  ;;  %v1553_v43 = vshrl.u32 %v946_v30, 5  ;;  %v749_v16 = vsel %vm626_vm10, %v748_v5, %v1506_v62 }
  0xe8   :  { %v741_v25 = vor.u32 4788187, %v740_v21  ;;  %v744_v28 = vcvt.s32.f32 %v737_v20  ;;  %v873_v62 = vadd.s32 %v1532_v14, %v1530_v6 }
  0xe9   :  { %v878_v36 = vadd.s32 536870912, %v877_v17  ;;  %v1542_v37 = vsub.s32 32, %v948_v33  ;;  %v951_v19 = vshll.u32 %v1213_v51, %v948_v33  ;;  %v954_v52 = vshll.u32 %v1214_v53, %v948_v33 }
  0xea   :  { %v742_v27 = vand.u32 2147483647, %v741_v25  ;;  %v960_v54 = vshll.u32 %v1216_v60, %v948_v33  ;;  %v957_v59 = vshll.u32 %v1215_v57, %v948_v33  ;;  %v963_v61 = vshll.u32 %v1217_v63, %v948_v33 }
  0xeb   :  { %v1551_v18 = vshrl.u32 %v878_v36, 30  ;;  %v952_v44 = vshrl.u32 %v1214_v53, %v1542_v37  ;;  %v955_v45 = vshrl.u32 %v1215_v57, %v1542_v37  ;;  %v958_v46 = vshrl.u32 %v1216_v60, %v1542_v37 }
  0xec   :  { %v745_v35 = vmul.f32 %v744_v28, %v742_v27  ;;  %v961_v48 = vshrl.u32 %v1217_v63, %v1542_v37  ;;  %v964_v4 = vshrl.u32 %v1218_v2, %v1542_v37  ;;  %v1590_v57 = vshll.u32 %v942_v41, 8 }
  0xed   :  { %v880_v49 = vshll.u32 %v1551_v18, 30  ;;  %v1580_v0 = vor.u32 %v952_v44, %v951_v19  ;;  %v1582_v1 = vor.u32 %v955_v45, %v954_v52  ;;  %v1587_v38 = vor.u32 %v958_v46, %v957_v59 }
  0xee   :  { %v746_v42 = vxor.u32 2147483648, %v745_v35  ;;  %v962_v3 = vor.u32 %v961_v48, %v960_v54  ;;  %v965_v7 = vor.u32 %v964_v4, %v963_v61  ;;  %vm966_vm12 = vcmp.lt.s32.totalorder %v1553_v43, 1 }
  0xef   :  { %v881_v58 = vsub.s32 %v877_v17, %v880_v49  ;;  %vm969_vm13 = vcmp.lt.s32.totalorder %v1553_v43, 4  ;;  %vm968_vm14 = vcmp.lt.s32.totalorder %v1553_v43, 3  ;;  %v974_v2 = vsel %vm966_vm12, %v1580_v0, %v1582_v1 }
  0xf0   :  { %v747_v32 = vsel %vm626_vm10, %v746_v42, %v745_v35  ;;  %v975_v10 = vsel %vm969_vm13, %v962_v3, 920167782  ;;  %vm967_vm15 = vcmp.lt.s32.totalorder %v1553_v43, 2  ;;  %v978_v12 = vsel %vm966_vm12, %v1582_v1, %v1587_v38 }
  0xf1   :  { %v1569_v13 = vsel %vm1546_vm9, %v1390_v29, %v747_v32  ;;  %vm882_vm11 = vcmp.lt.s32.totalorder %v881_v58, 0  ;;  %v883_v60 = vsub.s32 0, %v881_v58  ;;  %v976_v34 = vsel %vm968_vm14, %v1587_v38, %v975_v10 }
  0xf2   :  { %v1576_v56 = vmul.f32 %v1569_v13, %v1569_v13  ;;  %v977_v20 = vsel %vm967_vm15, %v974_v2, %v976_v34  ;;  %v979_v21 = vsel %vm969_vm13, %v965_v7, 1326507024  ;;  %v983_v50 = vand.u32 65535, %v1590_v57 }
  0xf3   :  { %v884_v8 = vsel %vm882_vm11, %v883_v60, %v881_v58  ;;  %v980_v25 = vsel %vm968_vm14, %v962_v3, %v979_v21  ;;  %v984_v27 = vshrl.u32 %v1590_v57, 16  ;;  %v1008_v28 = vshrl.u32 %v977_v20, 16 }
  0xf4   :  { %v760_v53 = vmul.f32 -0.00019511016, %v1576_v56  ;;  %v885_v9 = vclz %v884_v8  ;;  %v981_v26 = vsel %vm967_vm15, %v978_v12, %v980_v25  ;;  %v1007_v33 = vand.u32 65535, %v977_v20 }
  0xf5   :  { %v985_v30 = vand.u32 65535, %v981_v26  ;;  %v986_v31 = vshrl.u32 %v981_v26, 16  ;;  %v1010_v46 = vmul.u32 %v1008_v28, %v983_v50  ;;  %v751_v48 = vsel %vm1546_vm9, 0, %v749_v16 }
  0xf6   :  { %v761_v63 = vadd.f32 0.008332121, %v760_v53  ;;  %v1114_v15 = vadd.s32 4294967294, %v885_v9  ;;  %v1009_v54 = vmul.u32 %v1007_v33, %v983_v50  ;;  %v1011_v4 = vmul.u32 %v1007_v33, %v984_v27 }
  0xf7   :  { %v988_v41 = vmul.u32 %v986_v31, %v983_v50  ;;  %v989_v44 = vmul.u32 %v985_v30, %v984_v27  ;;  %v987_v19 = vmul.u32 %v985_v30, %v983_v50  ;;  %v990_v6 = vmul.u32 %v986_v31, %v984_v27 }
  0xf8   :  { %v762_v11 = vmul.f32 %v761_v63, %v1576_v56  ;;  %vm1115_vm0 = vcmp.lt.s32.totalorder %v1114_v15, 0  ;;  %v1013_v7 = vshll.u32 %v1010_v46, 16  ;;  %v1012_v9 = vmul.u32 %v1008_v28, %v984_v27 }
  0xf9   :  { %v888_v17 = vsel %vm1115_vm0, 0, %v1114_v15  ;;  %v991_v52 = vshll.u32 %v988_v41, 16  ;;  %v993_v14 = vshll.u32 %v989_v44, 16  ;;  %v992_v60 = vshrl.u32 %v988_v41, 16 }
  0xfa   :  { %v763_v24 = vadd.f32 -0.16666654, %v762_v11  ;;  %v889_v36 = vsub.s32 32, %v888_v17  ;;  %v893_v42 = vsub.s32 4294967266, %v888_v17  ;;  %v890_v45 = vshll.u32 %v881_v58, %v888_v17 }
  0xfb   :  { %vm995_vm2 = vc.u32 %v987_v19, %v991_v52  ;;  %v997_v53 = vadd.s32 %v991_v52, %v987_v19  ;;  %v1015_v11 = vshll.u32 %v1011_v4, 16  ;;  %vm1017_vm5 = vc.u32 %v1009_v54, %v1013_v7 }
  0xfc   :  { %v764_v35 = vmul.f32 %v763_v24, %v1576_v56  ;;  %v891_v32 = vshrl.u32 %v873_v62, %v889_v36  ;;  %v894_v49 = vadd.s32 127, %v893_v42  ;;  %v996_v5 = vsel %vm995_vm2, 1, %v1219_v47 }
  0xfd   :  { %v998_v8 = vadd.s32 %v996_v5, %v990_v6  ;;  %vm999_vm4 = vc.u32 %v997_v53, %v993_v14  ;;  %v1018_v22 = vsel %vm1017_vm5, 1, %v1219_v47  ;;  %v1019_v12 = vadd.s32 %v1013_v7, %v1009_v54 }
  0xfe   :  { %v765_v59 = vadd.f32 1.0, %v764_v35  ;;  %v892_v61 = vor.u32 %v891_v32, %v890_v45  ;;  %v895_v3 = vshll.u32 %v894_v49, 23  ;;  %v1000_v10 = vsel %vm999_vm4, 1, %v1219_v47 }
  0xff   :  { %v1002_v34 = vadd.s32 %v1000_v10, %v998_v8  ;;  %v753_v15 = vmul.f32 -0.001358992, %v1576_v56  ;;  %v768_v20 = vadd.s32 3, %v751_v48  ;;  %v950_v16 = vshrl.u32 %v1213_v51, %v1542_v37 }
 0x100   :  { %v896_v39 = vor.u32 4788187, %v895_v3  ;;  %v899_v63 = vcvt.s32.f32 %v892_v61  ;;  %v1020_v24 = vadd.s32 %v1018_v22, %v1012_v9  ;;  %v971_v25 = vsel %vm969_vm13, %v1587_v38, 2102212464 }
 0x101   :  { %v1003_v50 = vadd.s32 %v1002_v34, %v992_v60  ;;  %vm1021_vm6 = vc.u32 %v1019_v12, %v1015_v11  ;;  %v754_v26 = vadd.f32 0.041655596, %v753_v15  ;;  %v903_v28 = vsub.s32 4, %v1551_v18 }
 0x102   :  { %v897_v2 = vand.u32 2147483647, %v896_v39  ;;  %v994_v17 = vshrl.u32 %v989_v44, 16  ;;  %v1022_v30 = vsel %vm1021_vm6, 1, %v1219_v47  ;;  %v766_v31 = vmul.f32 %v765_v59, %v1569_v13 }
 0x103   :  { %v1014_v33 = vshrl.u32 %v1010_v46, 16  ;;  %v1024_v35 = vadd.s32 %v1022_v30, %v1020_v24  ;;  %v755_v51 = vmul.f32 %v754_v26, %v1576_v56  ;;  %v970_v38 = vsel %vm966_vm12, %v950_v16, %v1580_v0 }
 0x104   :  { %v900_v21 = vmul.f32 %v899_v63, %v897_v2  ;;  %v972_v62 = vsel %vm968_vm14, %v1582_v1, %v971_v25  ;;  %v1656_v36 = vadd.s32 %v1003_v50, %v994_v17  ;;  %v1016_v13 = vshrl.u32 %v1011_v4, 16 }
 0x105   :  { %v1025_v42 = vadd.s32 %v1024_v35, %v1014_v33  ;;  %v769_v41 = vand.u32 3, %v768_v20  ;;  %v1023_v45 = vadd.s32 %v1019_v12, %v1015_v11  ;;  %v756_v32 = vadd.f32 -0.4999988, %v755_v51 }
 0x106   :  { %v901_v27 = vxor.u32 2147483648, %v900_v21  ;;  %v772_v49 = vxor.u32 2147483648, %v766_v31  ;;  %v904_v0 = vsel %vm781_vm1, %v903_v28, %v1551_v18  ;;  %v973_v1 = vsel %vm967_vm15, %v970_v38, %v972_v62 }
 0x107   :  { %v1026_v46 = vadd.s32 %v1025_v42, %v1016_v13  ;;  %vm1029_vm7 = vc.u32 %v1656_v36, %v1023_v45  ;;  %v757_v19 = vmul.f32 %v756_v32, %v1576_v56  ;;  %v1027_v61 = vmul.u32 %v1590_v57, %v973_v1 }
 0x108   :  { %v902_v37 = vsel %vm781_vm1, %v901_v27, %v900_v21  ;;  %v906_v6 = vsel %vm1631_vm3, 0, %v904_v0  ;;  %vm771_vm8 = vcmp.eq.s32.totalorder %v769_v41, 0  ;;  %vm774_vm9 = vcmp.eq.s32.totalorder %v769_v41, 2 }
 0x109   :  { %v905_v47 = vsel %vm1631_vm3, %v1402_v55, %v902_v37  ;;  %v1030_v54 = vadd.s32 1, %v1026_v46  ;;  %v758_v3 = vadd.f32 1.0, %v757_v19  ;;  %vm770_vm10 = vcmp.lt.s32.totalorder %v769_v41, 2 }
 0x10a   :  { %v907_v44 = vmul.f32 %v905_v47, %v905_v47  ;;  %v923_v63 = vadd.s32 3, %v906_v6  ;;  %vm767_vm11 = vweird.f32 %v1390_v29  ;;  %vm922_vm0 = vweird.f32 %v1402_v55 }
 0x10b   :  { %v1031_v18 = vsel %vm1029_vm7, %v1030_v54, %v1026_v46  ;;  %v773_v53 = vsel %vm771_vm8, %v758_v3, %v772_v49  ;;  %v775_v39 = vxor.u32 2147483648, %v758_v3  ;;  %vm936_vm2 = vcmp.lt.s32.totalorder %v1515_v40, 0 }
 0x10c   :  { %v915_v48 = vmul.f32 -0.00019511016, %v907_v44  ;;  %v908_v52 = vmul.f32 -0.001358992, %v907_v44  ;;  %v1032_v14 = vadd.s32 %v1031_v18, %v1027_v61  ;;  %v924_v22 = vand.u32 3, %v923_v63 }
 0x10d   :  { %v776_v7 = vsel %vm774_vm9, %v775_v39, %v766_v31  ;;  %v1028_v31 = vadd.s32 %v1023_v45, %v1656_v36  ;;  %vm935_vm3 = vcmp.le.f32.partialorder %v934_v23, 0.7853982  ;;  %vm1077_vm7 = vweird.f32 %v1515_v40 }
 0x10e   :  { %v916_v59 = vadd.f32 0.008332121, %v915_v48  ;;  %v909_v4 = vadd.f32 0.041655596, %v908_v52  ;;  %v1033_v56 = vadd.s32 536870912, %v1032_v14  ;;  %v777_v57 = vsel %vm770_vm10, %v773_v53, %v776_v7 }
 0x10f   :  { %v778_v2 = vsel %vm767_vm11, nan, %v777_v57  ;;  %vm926_vm13 = vcmp.eq.s32.totalorder %v924_v22, 0  ;;  %vm929_vm14 = vcmp.eq.s32.totalorder %v924_v22, 2  ;;  %vm925_vm15 = vcmp.lt.s32.totalorder %v924_v22, 2 }
 0x110   :  { %v917_v43 = vmul.f32 %v916_v59, %v907_v44  ;;  %v910_v60 = vmul.f32 %v909_v4, %v907_v44  ;;  %v1034_v58 = vshrl.u32 %v1033_v56, 30  ;;  %1089 = vst [vmem:[#allocation7] sm:$0xff] %v778_v2 }
 0x112   :  { %v918_v5 = vadd.f32 -0.16666654, %v917_v43  ;;  %v911_v8 = vadd.f32 -0.4999988, %v910_v60  ;;  %v1035_v34 = vshll.u32 %v1034_v58, 30  ;;  %v1058_v49 = vsub.s32 4, %v1034_v58 }
 0x114   :  { %v919_v9 = vmul.f32 %v918_v5, %v907_v44  ;;  %v912_v10 = vmul.f32 %v911_v8, %v907_v44  ;;  %v1036_v20 = vsub.s32 %v1032_v14, %v1035_v34  ;;  %v1059_v46 = vsel %vm936_vm2, %v1058_v49, %v1034_v58 }
 0x115   :  { %v1061_v52 = vsel %vm935_vm3, 0, %v1059_v46 }
 0x116   :  { %v920_v11 = vadd.f32 1.0, %v919_v9  ;;  %v913_v12 = vadd.f32 1.0, %v912_v10  ;;  %vm1037_vm12 = vcmp.lt.s32.totalorder %v1036_v20, 0  ;;  %v1038_v24 = vsub.s32 0, %v1036_v20 }
 0x117   :  { %v1078_v4 = vadd.s32 3, %v1061_v52 }
 0x118   :  { %v921_v15 = vmul.f32 %v920_v11, %v905_v47  ;;  %v930_v21 = vxor.u32 2147483648, %v913_v12  ;;  %v1039_v29 = vsel %vm1037_vm12, %v1038_v24, %v1036_v20 }
 0x119   :  { %v1040_v26 = vclz %v1039_v29  ;;  %v1079_v14 = vand.u32 3, %v1078_v4 }
 0x11a   :  { %v927_v16 = vxor.u32 2147483648, %v921_v15  ;;  %v931_v50 = vsel %vm929_vm14, %v930_v21, %v921_v15 }
 0x11b   :  { %v1117_v17 = vadd.s32 4294967294, %v1040_v26  ;;  %vm1081_vm4 = vcmp.eq.s32.totalorder %v1079_v14, 0  ;;  %vm1084_vm5 = vcmp.eq.s32.totalorder %v1079_v14, 2  ;;  %vm1080_vm6 = vcmp.lt.s32.totalorder %v1079_v14, 2 }
 0x11c   :  { %v928_v25 = vsel %vm926_vm13, %v913_v12, %v927_v16 }
 0x11d   :  { %v932_v27 = vsel %vm925_vm15, %v928_v25, %v931_v50  ;;  %vm1118_vm1 = vcmp.lt.s32.totalorder %v1117_v17, 0 }
 0x11e   :  { %v933_v28 = vsel %vm922_vm0, nan, %v932_v27  ;;  %v1043_v30 = vsel %vm1118_vm1, 0, %v1117_v17 }
 0x11f   :  { %1090 = vst [vmem:[#allocation7 + $0x8] sm:$0xff] %v933_v28  ;;  %v1044_v33 = vsub.s32 32, %v1043_v30  ;;  %v1048_v35 = vsub.s32 4294967266, %v1043_v30  ;;  %v1045_v51 = vshll.u32 %v1036_v20, %v1043_v30 }
 0x121   :  { %v1046_v37 = vshrl.u32 %v1028_v31, %v1044_v33  ;;  %v1049_v38 = vadd.s32 127, %v1048_v35 }
 0x123   :  { %v1047_v62 = vor.u32 %v1046_v37, %v1045_v51  ;;  %v1050_v47 = vshll.u32 %v1049_v38, 23 }
 0x125   :  { %v1051_v13 = vor.u32 4788187, %v1050_v47  ;;  %v1054_v41 = vcvt.s32.f32 %v1047_v62 }
 0x127   :  { %v1052_v42 = vand.u32 2147483647, %v1051_v13 }
 0x129   :  { %v1055_v44 = vmul.f32 %v1054_v41, %v1052_v42 }
 0x12b   :  { %v1056_v55 = vxor.u32 2147483648, %v1055_v44 }
 0x12d   :  { %v1057_v32 = vsel %vm936_vm2, %v1056_v55, %v1055_v44 }
 0x12e   :  { %v1060_v36 = vsel %vm935_vm3, %v1515_v40, %v1057_v32 }
 0x12f   :  { %v1062_v45 = vmul.f32 %v1060_v36, %v1060_v36 }
 0x131   :  { %v1070_v0 = vmul.f32 -0.00019511016, %v1062_v45  ;;  %v1063_v1 = vmul.f32 -0.001358992, %v1062_v45 }
 0x133   :  { %v1071_v48 = vadd.f32 0.008332121, %v1070_v0  ;;  %v1064_v19 = vadd.f32 0.041655596, %v1063_v1 }
 0x135   :  { %v1072_v54 = vmul.f32 %v1071_v48, %v1062_v45  ;;  %v1065_v59 = vmul.f32 %v1064_v19, %v1062_v45 }
 0x137   :  { %v1073_v61 = vadd.f32 -0.16666654, %v1072_v54  ;;  %v1066_v3 = vadd.f32 -0.4999988, %v1065_v59 }
 0x139   :  { %v1074_v6 = vmul.f32 %v1073_v61, %v1062_v45  ;;  %v1067_v18 = vmul.f32 %v1066_v3, %v1062_v45 }
 0x13b   :  { %v1075_v43 = vadd.f32 1.0, %v1074_v6  ;;  %v1068_v23 = vadd.f32 1.0, %v1067_v18 }
 0x13d   :  { %v1076_v53 = vmul.f32 %v1075_v43, %v1060_v36  ;;  %v1085_v39 = vxor.u32 2147483648, %v1068_v23 }
 0x13f   :  { %v1082_v60 = vxor.u32 2147483648, %v1076_v53  ;;  %v1086_v56 = vsel %vm1084_vm5, %v1085_v39, %v1076_v53 }
 0x141   :  { %v1083_v5 = vsel %vm1081_vm4, %v1068_v23, %v1082_v60 }
 0x142   :  { %v1087_v7 = vsel %vm1080_vm6, %v1083_v5, %v1086_v56 }
 0x143   :  { %v1088_v63 = vsel %vm1077_vm7, nan, %v1087_v7 }
 0x144   :  { %1091 = vst [vmem:[#allocation7 + $0x10] sm:$0xff] %v1088_v63 }
 0x145   :  { %1102 = dma.vmem_to_hbm [thread:$0]  %s1098_s1, 384, %s1100_s23, [#allocation4]  }
 0x146   :  { %1207 = dma.done.wait [#allocation4], 384  }
 0x147   :  { %1208 = vsyncadd [#allocation4], 4294966912 }
 0x148   :  { %1107 = vsyncpa [#allocation3], 1 }
 0x149   :  { %1108 = vsyncpa [#allocation6], 1 }
 0x14a   :  { %1109 = vsyncpa [#allocation4], 1 }

</bundles_post_ra>
